<compile_context>
chip_gen: v5e
topology: v5e:2x2
jax: 0.10.0
libtpu: 0.0.40
codegen_flags: <defaults>
</compile_context>

<pallas_src>
import math

import jax
import jax.numpy as jnp
from jax import lax
from jax.experimental import pallas as pl
from jax.experimental.pallas import tpu as pltpu

NUM_DIST = 14          # len(buckets) + 1
BN_EPS = 1e-5


def head_kernel(bert_ref, off_ref, dist_ref, url_ref,
                w_att_ref, b_att_ref, embed_ref,
                w1a_ref, w1b_ref, w1c_ref, b1_ref, w2_ref, b2_ref,
                ws_s_ref, ws_d_ref, bs_ref,
                wf_a_ref, wf_b_ref, wf_u_ref, bf_ref,
                out_ref):
    x = bert_ref[...]                                # (TB, T, H) bf16 (MXU input)
    offs = off_ref[...]                              # (TB, 7) int32
    dists = dist_ref[...]                            # (TB, 2) int32
    urls = url_ref[...].astype(jnp.float32)          # (TB, 2)

    TB, T, H = x.shape
    bn_scale = (1.0 + BN_EPS) ** -0.5                # eval-mode BatchNorm1d w/ init stats

    # --- SelfAttentiveSpanExtractor attention logits: one MXU contraction -----
    # (TB,1,H) . (TB,T,H) -> (TB,1,T) instead of a VPU multiply + lane reduce.
    w_att = jnp.broadcast_to(w_att_ref[...][None, :, :], (TB, 1, H)).astype(x.dtype)
    att = jnp.einsum('bkh,bth->bkt', w_att, x,
                     preferred_element_type=jnp.float32)[:, 0, :]   # (TB, T) f32
    att = att + b_att_ref[0, 0]          # one VPU add (softmax is shift-invariant anyway)

    pos = lax.broadcasted_iota(jnp.int32, (TB, T), 1)

    def span_weights(start, end):                    # (TB,1) each; inclusive, start <= end
        m = (pos >= start) & (pos <= end)
        logits = jnp.where(m, att, -1e30)
        # masked entries underflow to exactly 0 after the max shift -> no extra mask mul
        p = jnp.exp(logits - jnp.max(logits, axis=-1, keepdims=True))
        inv = pl.reciprocal(jnp.sum(p, axis=-1, keepdims=True), approx=True)  # EUP slot
        return p * inv

    w_a = span_weights(offs[:, 0:1], offs[:, 1:2])                  # (TB, T) f32
    w_b = span_weights(offs[:, 2:3], offs[:, 3:4])
    w_p = (pos == offs[:, 4:5]).astype(jnp.float32)                 # pronoun one-hot
    # NOTE: the url span (offsets[:, 5:7]) is computed but never used in the
    # reference forward, so it is omitted here (no effect on the output).

    # --- single fused pooling pass over x (MXU): (TB,3,T) . (TB,T,H) -> (TB,3,H)
    w_all = jnp.concatenate(
        [w_a[:, None, :], w_b[:, None, :], w_p[:, None, :]], axis=1).astype(x.dtype)
    pooled = jnp.einsum('bst,bth->bsh', w_all, x,
                        preferred_element_type=jnp.float32)         # (TB, 3, H) f32
    a_ctx = pooled[:, 0, :]
    b_ctx = pooled[:, 1, :]
    p_ctx = pooled[:, 2, :]

    # --- distance embedding lookup: one stacked one-hot @ table matmul -------
    # rows [0, TB) -> A distances, rows [TB, 2TB) -> B distances
    ids2 = lax.broadcasted_iota(jnp.int32, (2 * TB, NUM_DIST), 1)
    d_stack = jnp.concatenate([dists[:, 0:1], dists[:, 1:2]], axis=0)   # (2TB, 1)
    oh = (ids2 == d_stack).astype(jnp.float32)                          # (2TB, 14)
    dist_stack = jnp.dot(oh, embed_ref[...],
                         preferred_element_type=jnp.float32)            # (2TB, E)

    # --- fc_score: BN -> Linear(3H -> Lh) -> ReLU -> BN -> Linear(Lh -> E*R) ---
    # concat([c*P, c, P]) @ W1 done as a split matmul on the pre-split w1 pieces,
    # with the A and B paths stacked along the row axis (2TB rows, one matmul
    # chain) and the shared P-term computed once.
    w1a = w1a_ref[...]; w1b = w1b_ref[...]; w1c = w1c_ref[...]      # (H, Lh) bf16
    b1 = b1_ref[...]; w2 = w2_ref[...]; b2 = b2_ref[...]

    cp_stack = jnp.concatenate([a_ctx * p_ctx, b_ctx * p_ctx], axis=0).astype(w1a.dtype)
    c_stack = jnp.concatenate([a_ctx, b_ctx], axis=0).astype(w1b.dtype)
    zp = jnp.dot(p_ctx.astype(w1c.dtype), w1c,
                 preferred_element_type=jnp.float32)                # shared P-term (TB, Lh)
    z = (jnp.dot(cp_stack, w1a, preferred_element_type=jnp.float32)
         + jnp.dot(c_stack, w1b, preferred_element_type=jnp.float32)
         + jnp.concatenate([zp, zp], axis=0))
    h = jnp.maximum(z * bn_scale + b1, 0.0)
    score_stack = (jnp.dot(h * bn_scale, w2, preferred_element_type=jnp.float32)
                   + b2)                                             # (2TB, ER)

    # --- fc_s: BN -> Linear(E*(R+1) -> E*(R+1)) -> ReLU on concat([score, dist]) ---
    zs = (jnp.dot(score_stack, ws_s_ref[...], preferred_element_type=jnp.float32)
          + jnp.dot(dist_stack, ws_d_ref[...], preferred_element_type=jnp.float32))
    s_stack = jnp.maximum(zs * bn_scale + bs_ref[...], 0.0)          # (2TB, ER+E)

    score_a = s_stack[:TB]                                           # clean sublane slices
    score_b = s_stack[TB:]

    # --- fc_final: Linear(2*(ER+E) + 2 -> 3), split matmul (no lane concat) ---
    out = (jnp.dot(score_a, wf_a_ref[...], preferred_element_type=jnp.float32)
           + jnp.dot(score_b, wf_b_ref[...], preferred_element_type=jnp.float32)
           + jnp.dot(urls, wf_u_ref[...], preferred_element_type=jnp.float32)
           + bf_ref[...])
    out_ref[...] = out.astype(out_ref.dtype)


def _round_up(n, m):
    return pl.cdiv(n, m) * m


def _physical_vmem_bytes():
    try:
        cap = getattr(pltpu.get_tpu_info(), "vmem_capacity_bytes", None)
        if cap:
            return int(cap)
    except Exception:
        pass
    return 64 * 1024 * 1024          # v7x worst case


def _choose_batch_tile(B, T, H, weight_bytes, budget_bytes):
    """Pick the batch tile: as large as possible (amortizes the ~0.35 us/step
    pipeline overhead and feeds the MXU a bigger M) while double-buffered bf16
    x-tiles + resident weights + f32 intermediates stay inside the VMEM
    planning budget (v7x has only 64 MiB)."""
    per_row = 2 * T * H * 2          # double-buffered bf16 x rows
    per_row += 8 * T * 4             # att / masks / softmax-weight rows (f32, headroom)
    per_row += 16 * H * 4            # pooled / context / stacked-activation rows (f32)
    avail = max(budget_bytes - weight_bytes, 2 * 1024 * 1024)
    tb = (avail // per_row) // 8 * 8
    tb = max(8, min(256, int(tb)))   # multiple of 8 (sublane), capped at 256
    return min(tb, _round_up(B, 8))


def gap_head_forward(bert_outputs, offsets, dists, in_urls, params, *, tb=None):
    B, T, H = bert_outputs.shape
    phys_vmem = _physical_vmem_bytes()
    weight_bytes = sum(v.size * v.dtype.itemsize for v in params.values())
    if tb is None:
        tb = _choose_batch_tile(B, T, H, weight_bytes, int(phys_vmem * 0.7))
    B_pad = _round_up(B, tb)

    # bf16 in HBM/VMEM halves bandwidth + footprint of the dominant tensor;
    # all matmuls accumulate in f32 via preferred_element_type.
    x = bert_outputs.astype(jnp.bfloat16)
    if B_pad != B:
        pad = B_pad - B
        x = jnp.pad(x, ((0, pad), (0, 0), (0, 0)))
        offsets = jnp.pad(offsets, ((0, pad), (0, 0)))   # zeros -> valid [0, 0] spans
        dists = jnp.pad(dists, ((0, pad), (0, 0)))
        in_urls = jnp.pad(in_urls, ((0, pad), (0, 0)))

    weight_args = (params["w_att"], params["b_att"], params["embed"],
                   params["w1a"], params["w1b"], params["w1c"], params["b1"],
                   params["w2"], params["b2"],
                   params["ws_s"], params["ws_d"], params["bs"],
                   params["wf_a"], params["wf_b"], params["wf_u"], params["bf"])

    # Batch-tiled inputs (offsets/dists/urls are tiny; they ride along as small
    # VMEM tiles because the span masks need them as per-row vectors).
    batch_specs = [
        pl.BlockSpec((tb, T, H), lambda i: (i, 0, 0)),
        pl.BlockSpec((tb, 7), lambda i: (i, 0)),
        pl.BlockSpec((tb, 2), lambda i: (i, 0)),
        pl.BlockSpec((tb, 2), lambda i: (i, 0)),
    ]
    # Weights/biases: constant block index -> DMA'd once, VMEM-resident across grid.
    weight_specs = [pl.BlockSpec(w.shape, lambda i: (0, 0)) for w in weight_args]

    out = pl.pallas_call(
        head_kernel,
        out_shape=jax.ShapeDtypeStruct((B_pad, 3), jnp.float32),
        grid_spec=pltpu.PrefetchScalarGridSpec(
            num_scalar_prefetch=0,
            grid=(B_pad // tb,),
            in_specs=batch_specs + weight_specs,
            out_specs=pl.BlockSpec((tb, 3), lambda i: (i, 0)),
        ),
        compiler_params=pltpu.CompilerParams(
            dimension_semantics=("parallel",),              # 2 TCs on v7x split the grid
            vmem_limit_bytes=int(phys_vmem * 0.85),
        ),
    )(x, offsets, dists, in_urls, *weight_args)
    return out[:B]


def init_params(key, H_total, Lh, E, R):
    """Deterministic synthetic parameter init (kaiming-normal for the re-inited
    Linears, zeros for their biases, N(0,1) for the embedding table). Large
    weights pre-transposed to (in, out), pre-split to avoid in-kernel slicing,
    and the big ones stored in bf16."""
    C3 = 3 * H_total
    ER = E * R
    S = E * (R + 1)
    ks = jax.random.split(key, 6)

    def kaiming(k, out_f, in_f):                     # torch Linear weight is (out, in)
        return jax.random.normal(k, (out_f, in_f), jnp.float32) * math.sqrt(2.0 / in_f)

    w1 = kaiming(ks[2], Lh, C3).T                    # (3H, Lh)
    ws = kaiming(ks[4], S, S).T                      # (S, S)
    wf = kaiming(ks[5], 3, 2 * S + 2).T              # (2S+2, 3)

    return {
        # span-extractor global attention Linear(H_total -> 1), lane-last, bf16
        "w_att": (jax.random.normal(ks[0], (1, H_total), jnp.float32)
                  / math.sqrt(H_total)).astype(jnp.bfloat16),
        "b_att": jnp.zeros((1, 1), jnp.float32),
        # nn.Embedding(14, E) default init ~ N(0, 1)
        "embed": jax.random.normal(ks[1], (NUM_DIST, E), jnp.float32),
        # fc_score Linear(3H -> Lh) pre-split along input rows: (c*P | c | P)
        "w1a": w1[:H_total].astype(jnp.bfloat16),
        "w1b": w1[H_total:2 * H_total].astype(jnp.bfloat16),
        "w1c": w1[2 * H_total:].astype(jnp.bfloat16),
        "b1": jnp.zeros((1, Lh), jnp.float32),
        "w2": kaiming(ks[3], ER, Lh).T,
        "b2": jnp.zeros((1, ER), jnp.float32),
        # fc_s Linear(S -> S) pre-split along input rows: (score | dist_embed)
        "ws_s": ws[:ER],
        "ws_d": ws[ER:],
        "bs": jnp.zeros((1, S), jnp.float32),
        # fc_final Linear(2S+2 -> 3) pre-split: score_A | score_B | (a_in_url, b_in_url)
        "wf_a": wf[:S],
        "wf_b": wf[S:2 * S],
        "wf_u": wf[2 * S:],
        "bf": jnp.zeros((1, 3), jnp.float32),
    }


if __name__ == "__main__":
    # Small stand-in shapes (real model: H_total = 1024 * len(use_layer), T = 490).
    B, T = 4, 16
    H_total = 32          # bert_hidden_size * use_layers (small synthetic size)
    Lh, E, R = 64, 4, 4   # linear_hidden_size, dist_embed_dim, token_dist_ratio

    key = jax.random.PRNGKey(0)
    k_bert, k_s, k_len, k_p, k_d, k_u, k_par = jax.random.split(key, 7)

    # TODO(synk): BERT encoder + bert_cache are untranslatable; synthesize its output.
    bert_outputs = jax.random.normal(k_bert, (B, T, H_total), jnp.float32)

    # offsets columns: [a_start, a_end, b_start, b_end, pronoun_idx, url_start, url_end]
    starts = jax.random.randint(k_s, (B, 3), 0, T // 2)
    lengths = jax.random.randint(k_len, (B, 3), 0, 3)
    ends = jnp.minimum(starts + lengths, T - 1)
    p_idx = jax.random.randint(k_p, (B, 1), 0, T)
    offsets = jnp.concatenate(
        [starts[:, 0:1], ends[:, 0:1],
         starts[:, 1:2], ends[:, 1:2],
         p_idx,
         starts[:, 2:3], ends[:, 2:3]], axis=1).astype(jnp.int32)

    dists = jax.random.randint(k_d, (B, 2), 0, NUM_DIST).astype(jnp.int32)
    in_urls = jax.random.randint(k_u, (B, 2), 0, 2).astype(jnp.float32)

    params = init_params(k_par, H_total, Lh, E, R)

    out = gap_head_forward(bert_outputs, offsets, dists, in_urls, params)
    out = jax.block_until_ready(out)
    assert out.shape == (B, 3) and out.dtype == jnp.float32
    assert bool(jnp.all(jnp.isfinite(out)))
    print("KERNEL_OK")
</pallas_src>

<mosaic_0001>
module attributes {stable_mosaic.version = 11 : i64} {
  func.func @head_kernel(%arg0: i32, %arg1: memref<8x16x32xbf16, #tpu.memory_space<vmem>>, %arg2: memref<8x7xi32, #tpu.memory_space<vmem>>, %arg3: memref<8x2xi32, #tpu.memory_space<vmem>>, %arg4: memref<8x2xf32, #tpu.memory_space<vmem>>, %arg5: memref<1x32xbf16, #tpu.memory_space<vmem>>, %arg6: memref<1x1xf32, #tpu.memory_space<vmem>>, %arg7: memref<14x4xf32, #tpu.memory_space<vmem>>, %arg8: memref<32x64xbf16, #tpu.memory_space<vmem>>, %arg9: memref<32x64xbf16, #tpu.memory_space<vmem>>, %arg10: memref<32x64xbf16, #tpu.memory_space<vmem>>, %arg11: memref<1x64xf32, #tpu.memory_space<vmem>>, %arg12: memref<64x16xf32, #tpu.memory_space<vmem>>, %arg13: memref<1x16xf32, #tpu.memory_space<vmem>>, %arg14: memref<16x20xf32, #tpu.memory_space<vmem>>, %arg15: memref<4x20xf32, #tpu.memory_space<vmem>>, %arg16: memref<1x20xf32, #tpu.memory_space<vmem>>, %arg17: memref<20x3xf32, #tpu.memory_space<vmem>>, %arg18: memref<20x3xf32, #tpu.memory_space<vmem>>, %arg19: memref<2x3xf32, #tpu.memory_space<vmem>>, %arg20: memref<1x3xf32, #tpu.memory_space<vmem>>, %arg21: memref<8x3xf32, #tpu.memory_space<vmem>>) attributes {dimension_semantics = [#tpu.dimension_semantics<parallel>], iteration_bounds = array<i64: 1>, scalar_prefetch = 0 : i64, scratch_operands = 0 : i64, tpu.core_type = #tpu.core_type<tc>, window_params = [{transform_indices = @transform_0, window_bounds = array<i64: 8, 16, 32>}, {transform_indices = @transform_1, window_bounds = array<i64: 8, 7>}, {transform_indices = @transform_2, window_bounds = array<i64: 8, 2>}, {transform_indices = @transform_3, window_bounds = array<i64: 8, 2>}, {pipeline_mode = #tpu.pipeline_mode<synchronous>, transform_indices = @transform_4, window_bounds = array<i64: 1, 32>}, {pipeline_mode = #tpu.pipeline_mode<synchronous>, transform_indices = @transform_5, window_bounds = array<i64: 1, 1>}, {pipeline_mode = #tpu.pipeline_mode<synchronous>, transform_indices = @transform_6, window_bounds = array<i64: 14, 4>}, {pipeline_mode = #tpu.pipeline_mode<synchronous>, transform_indices = @transform_7, window_bounds = array<i64: 32, 64>}, {pipeline_mode = #tpu.pipeline_mode<synchronous>, transform_indices = @transform_8, window_bounds = array<i64: 32, 64>}, {pipeline_mode = #tpu.pipeline_mode<synchronous>, transform_indices = @transform_9, window_bounds = array<i64: 32, 64>}, {pipeline_mode = #tpu.pipeline_mode<synchronous>, transform_indices = @transform_10, window_bounds = array<i64: 1, 64>}, {pipeline_mode = #tpu.pipeline_mode<synchronous>, transform_indices = @transform_11, window_bounds = array<i64: 64, 16>}, {pipeline_mode = #tpu.pipeline_mode<synchronous>, transform_indices = @transform_12, window_bounds = array<i64: 1, 16>}, {pipeline_mode = #tpu.pipeline_mode<synchronous>, transform_indices = @transform_13, window_bounds = array<i64: 16, 20>}, {pipeline_mode = #tpu.pipeline_mode<synchronous>, transform_indices = @transform_14, window_bounds = array<i64: 4, 20>}, {pipeline_mode = #tpu.pipeline_mode<synchronous>, transform_indices = @transform_15, window_bounds = array<i64: 1, 20>}, {pipeline_mode = #tpu.pipeline_mode<synchronous>, transform_indices = @transform_16, window_bounds = array<i64: 20, 3>}, {pipeline_mode = #tpu.pipeline_mode<synchronous>, transform_indices = @transform_17, window_bounds = array<i64: 20, 3>}, {pipeline_mode = #tpu.pipeline_mode<synchronous>, transform_indices = @transform_18, window_bounds = array<i64: 2, 3>}, {pipeline_mode = #tpu.pipeline_mode<synchronous>, transform_indices = @transform_19, window_bounds = array<i64: 1, 3>}, {transform_indices = @transform_20, window_bounds = array<i64: 8, 3>}]} {
    %c0 = arith.constant 0 : index
    %c0_0 = arith.constant 0 : index
    %c0_1 = arith.constant 0 : index
    %0 = vector.load %arg1[%c0, %c0_0, %c0_1] : memref<8x16x32xbf16, #tpu.memory_space<vmem>>, vector<8x16x32xbf16>
    %c0_2 = arith.constant 0 : index
    %c0_3 = arith.constant 0 : index
    %1 = vector.load %arg2[%c0_2, %c0_3] : memref<8x7xi32, #tpu.memory_space<vmem>>, vector<8x7xi32>
    %c0_4 = arith.constant 0 : index
    %c0_5 = arith.constant 0 : index
    %2 = vector.load %arg3[%c0_4, %c0_5] : memref<8x2xi32, #tpu.memory_space<vmem>>, vector<8x2xi32>
    %c0_6 = arith.constant 0 : index
    %c0_7 = arith.constant 0 : index
    %3 = vector.load %arg4[%c0_6, %c0_7] : memref<8x2xf32, #tpu.memory_space<vmem>>, vector<8x2xf32>
    %c0_8 = arith.constant 0 : index
    %c0_9 = arith.constant 0 : index
    %4 = vector.load %arg5[%c0_8, %c0_9] : memref<1x32xbf16, #tpu.memory_space<vmem>>, vector<1x32xbf16>
    %5 = vector.shape_cast %4 : vector<1x32xbf16> to vector<1x1x32xbf16>
    %6 = vector.shape_cast %5 : vector<1x1x32xbf16> to vector<1x1x32xbf16>
    %7 = vector.broadcast %6 : vector<1x1x32xbf16> to vector<8x1x32xbf16>
    "tpu.trace_start"() <{level = 10 : i32, message = "bkh,bth->bkt"}> : () -> ()
    %cst = arith.constant dense<0.000000e+00> : vector<8x1x16xf32>
    %8 = tpu.matmul %7, %0, %cst {dimension_numbers = #tpu.dot_dimension_numbers<[2], [2], [1], [1], [0, 0, 0, 1, 1, 1], [0], [0]>} : vector<8x1x32xbf16>, vector<8x16x32xbf16>, vector<8x1x16xf32> -> vector<8x1x16xf32>
    "tpu.trace_stop"() : () -> ()
    %9 = vector.shape_cast %8 : vector<8x1x16xf32> to vector<8x16xf32>
    %c0_10 = arith.constant 0 : index
    %c0_11 = arith.constant 0 : index
    %10 = vector.load %arg6[%c0_10, %c0_11] : memref<1x1xf32, #tpu.memory_space<vmem>>, vector<1x1xf32>
    %11 = vector.extract %10[0, 0] : f32 from vector<1x1xf32>
    %12 = vector.broadcast %11 : f32 to vector<8x16xf32>
    %13 = arith.addf %9, %12 : vector<8x16xf32>
    %14 = tpu.iota {dimensions = array<i32: 1>} : vector<8x16xi32>
    %15 = vector.extract_strided_slice %1 {offsets = [0, 0], sizes = [8, 1], strides = [1, 1]} : vector<8x7xi32> to vector<8x1xi32>
    %16 = vector.extract_strided_slice %1 {offsets = [0, 1], sizes = [8, 1], strides = [1, 1]} : vector<8x7xi32> to vector<8x1xi32>
    %17 = vector.broadcast %15 : vector<8x1xi32> to vector<8x16xi32>
    %18 = arith.cmpi sge, %14, %17 : vector<8x16xi32>
    %19 = vector.broadcast %16 : vector<8x1xi32> to vector<8x16xi32>
    %20 = arith.cmpi sle, %14, %19 : vector<8x16xi32>
    %21 = arith.andi %18, %20 : vector<8x16xi1>
    %cst_12 = arith.constant -1.000000e+30 : f32
    %22 = vector.broadcast %cst_12 : f32 to vector<8x16xf32>
    %23 = arith.select %21, %13, %22 : vector<8x16xi1>, vector<8x16xf32>
    %cst_13 = arith.constant dense<0xFF800000> : vector<8xf32>
    %24 = vector.multi_reduction <maximumf>, %23, %cst_13 [1] : vector<8x16xf32> to vector<8xf32>
    %25 = vector.shape_cast %24 : vector<8xf32> to vector<8x1xf32>
    %26 = vector.broadcast %25 : vector<8x1xf32> to vector<8x16xf32>
    %27 = arith.subf %23, %26 : vector<8x16xf32>
    %28 = math.exp %27 : vector<8x16xf32>
    %cst_14 = arith.constant dense<0.000000e+00> : vector<8xf32>
    %29 = vector.multi_reduction <add>, %28, %cst_14 [1] : vector<8x16xf32> to vector<8xf32>
    %30 = vector.shape_cast %29 : vector<8xf32> to vector<8x1xf32>
    %31 = tpu.reciprocal %30 {approx = true} : vector<8x1xf32> -> vector<8x1xf32>
    %32 = vector.broadcast %31 : vector<8x1xf32> to vector<8x16xf32>
    %33 = arith.mulf %28, %32 : vector<8x16xf32>
    %34 = vector.extract_strided_slice %1 {offsets = [0, 2], sizes = [8, 1], strides = [1, 1]} : vector<8x7xi32> to vector<8x1xi32>
    %35 = vector.extract_strided_slice %1 {offsets = [0, 3], sizes = [8, 1], strides = [1, 1]} : vector<8x7xi32> to vector<8x1xi32>
    %36 = vector.broadcast %34 : vector<8x1xi32> to vector<8x16xi32>
    %37 = arith.cmpi sge, %14, %36 : vector<8x16xi32>
    %38 = vector.broadcast %35 : vector<8x1xi32> to vector<8x16xi32>
    %39 = arith.cmpi sle, %14, %38 : vector<8x16xi32>
    %40 = arith.andi %37, %39 : vector<8x16xi1>
    %cst_15 = arith.constant -1.000000e+30 : f32
    %41 = vector.broadcast %cst_15 : f32 to vector<8x16xf32>
    %42 = arith.select %40, %13, %41 : vector<8x16xi1>, vector<8x16xf32>
    %cst_16 = arith.constant dense<0xFF800000> : vector<8xf32>
    %43 = vector.multi_reduction <maximumf>, %42, %cst_16 [1] : vector<8x16xf32> to vector<8xf32>
    %44 = vector.shape_cast %43 : vector<8xf32> to vector<8x1xf32>
    %45 = vector.broadcast %44 : vector<8x1xf32> to vector<8x16xf32>
    %46 = arith.subf %42, %45 : vector<8x16xf32>
    %47 = math.exp %46 : vector<8x16xf32>
    %cst_17 = arith.constant dense<0.000000e+00> : vector<8xf32>
    %48 = vector.multi_reduction <add>, %47, %cst_17 [1] : vector<8x16xf32> to vector<8xf32>
    %49 = vector.shape_cast %48 : vector<8xf32> to vector<8x1xf32>
    %50 = tpu.reciprocal %49 {approx = true} : vector<8x1xf32> -> vector<8x1xf32>
    %51 = vector.broadcast %50 : vector<8x1xf32> to vector<8x16xf32>
    %52 = arith.mulf %47, %51 : vector<8x16xf32>
    %53 = vector.extract_strided_slice %1 {offsets = [0, 4], sizes = [8, 1], strides = [1, 1]} : vector<8x7xi32> to vector<8x1xi32>
    %54 = vector.broadcast %53 : vector<8x1xi32> to vector<8x16xi32>
    %55 = arith.cmpi eq, %14, %54 : vector<8x16xi32>
    %56 = arith.extui %55 : vector<8x16xi1> to vector<8x16xi32>
    %57 = arith.sitofp %56 : vector<8x16xi32> to vector<8x16xf32>
    %58 = vector.shape_cast %33 : vector<8x16xf32> to vector<8x1x16xf32>
    %59 = vector.shape_cast %52 : vector<8x16xf32> to vector<8x1x16xf32>
    %60 = vector.shape_cast %57 : vector<8x16xf32> to vector<8x1x16xf32>
    %61 = tpu.concatenate %58, %59, %60 in 1 : vector<8x1x16xf32>, vector<8x1x16xf32>, vector<8x1x16xf32> -> vector<8x3x16xf32>
    %62 = arith.truncf %61 : vector<8x3x16xf32> to vector<8x3x16xbf16>
    "tpu.trace_start"() <{level = 10 : i32, message = "bst,bth->bsh"}> : () -> ()
    %cst_18 = arith.constant dense<0.000000e+00> : vector<8x3x32xf32>
    %63 = tpu.matmul %62, %0, %cst_18 {dimension_numbers = #tpu.dot_dimension_numbers<[2], [1], [1], [2], [0, 0, 0, 1, 1, 2], [0], [0]>} : vector<8x3x16xbf16>, vector<8x16x32xbf16>, vector<8x3x32xf32> -> vector<8x3x32xf32>
    "tpu.trace_stop"() : () -> ()
    %64 = vector.extract_strided_slice %63 {offsets = [0, 0, 0], sizes = [8, 1, 32], strides = [1, 1, 1]} : vector<8x3x32xf32> to vector<8x1x32xf32>
    %65 = vector.shape_cast %64 : vector<8x1x32xf32> to vector<8x32xf32>
    %66 = vector.extract_strided_slice %63 {offsets = [0, 1, 0], sizes = [8, 1, 32], strides = [1, 1, 1]} : vector<8x3x32xf32> to vector<8x1x32xf32>
    %67 = vector.shape_cast %66 : vector<8x1x32xf32> to vector<8x32xf32>
    %68 = vector.extract_strided_slice %63 {offsets = [0, 2, 0], sizes = [8, 1, 32], strides = [1, 1, 1]} : vector<8x3x32xf32> to vector<8x1x32xf32>
    %69 = vector.shape_cast %68 : vector<8x1x32xf32> to vector<8x32xf32>
    %70 = tpu.iota {dimensions = array<i32: 1>} : vector<16x14xi32>
    %71 = vector.extract_strided_slice %2 {offsets = [0, 0], sizes = [8, 1], strides = [1, 1]} : vector<8x2xi32> to vector<8x1xi32>
    %72 = vector.extract_strided_slice %2 {offsets = [0, 1], sizes = [8, 1], strides = [1, 1]} : vector<8x2xi32> to vector<8x1xi32>
    %73 = tpu.concatenate %71, %72 in 0 : vector<8x1xi32>, vector<8x1xi32> -> vector<16x1xi32>
    %74 = vector.broadcast %73 : vector<16x1xi32> to vector<16x14xi32>
    %75 = arith.cmpi eq, %70, %74 : vector<16x14xi32>
    %76 = arith.extui %75 : vector<16x14xi1> to vector<16x14xi32>
    %77 = arith.sitofp %76 : vector<16x14xi32> to vector<16x14xf32>
    %c0_19 = arith.constant 0 : index
    %c0_20 = arith.constant 0 : index
    %78 = vector.load %arg7[%c0_19, %c0_20] : memref<14x4xf32, #tpu.memory_space<vmem>>, vector<14x4xf32>
    %cst_21 = arith.constant dense<0.000000e+00> : vector<16x4xf32>
    %79 = tpu.matmul %77, %78, %cst_21 {dimension_numbers = #tpu.dot_dimension_numbers<[1], [0], [0], [1], [0, 0, 1, 1], [], []>} : vector<16x14xf32>, vector<14x4xf32>, vector<16x4xf32> -> vector<16x4xf32>
    %c0_22 = arith.constant 0 : index
    %c0_23 = arith.constant 0 : index
    %80 = vector.load %arg8[%c0_22, %c0_23] : memref<32x64xbf16, #tpu.memory_space<vmem>>, vector<32x64xbf16>
    %c0_24 = arith.constant 0 : index
    %c0_25 = arith.constant 0 : index
    %81 = vector.load %arg9[%c0_24, %c0_25] : memref<32x64xbf16, #tpu.memory_space<vmem>>, vector<32x64xbf16>
    %c0_26 = arith.constant 0 : index
    %c0_27 = arith.constant 0 : index
    %82 = vector.load %arg10[%c0_26, %c0_27] : memref<32x64xbf16, #tpu.memory_space<vmem>>, vector<32x64xbf16>
    %c0_28 = arith.constant 0 : index
    %c0_29 = arith.constant 0 : index
    %83 = vector.load %arg11[%c0_28, %c0_29] : memref<1x64xf32, #tpu.memory_space<vmem>>, vector<1x64xf32>
    %c0_30 = arith.constant 0 : index
    %c0_31 = arith.constant 0 : index
    %84 = vector.load %arg12[%c0_30, %c0_31] : memref<64x16xf32, #tpu.memory_space<vmem>>, vector<64x16xf32>
    %c0_32 = arith.constant 0 : index
    %c0_33 = arith.constant 0 : index
    %85 = vector.load %arg13[%c0_32, %c0_33] : memref<1x16xf32, #tpu.memory_space<vmem>>, vector<1x16xf32>
    %86 = arith.mulf %65, %69 : vector<8x32xf32>
    %87 = arith.mulf %67, %69 : vector<8x32xf32>
    %88 = tpu.concatenate %86, %87 in 0 : vector<8x32xf32>, vector<8x32xf32> -> vector<16x32xf32>
    %89 = arith.truncf %88 : vector<16x32xf32> to vector<16x32xbf16>
    %90 = tpu.concatenate %65, %67 in 0 : vector<8x32xf32>, vector<8x32xf32> -> vector<16x32xf32>
    %91 = arith.truncf %90 : vector<16x32xf32> to vector<16x32xbf16>
    %92 = arith.truncf %69 : vector<8x32xf32> to vector<8x32xbf16>
    %cst_34 = arith.constant dense<0.000000e+00> : vector<8x64xf32>
    %93 = tpu.matmul %92, %82, %cst_34 {dimension_numbers = #tpu.dot_dimension_numbers<[1], [0], [0], [1], [0, 0, 1, 1], [], []>} : vector<8x32xbf16>, vector<32x64xbf16>, vector<8x64xf32> -> vector<8x64xf32>
    %cst_35 = arith.constant dense<0.000000e+00> : vector<16x64xf32>
    %94 = tpu.matmul %89, %80, %cst_35 {dimension_numbers = #tpu.dot_dimension_numbers<[1], [0], [0], [1], [0, 0, 1, 1], [], []>} : vector<16x32xbf16>, vector<32x64xbf16>, vector<16x64xf32> -> vector<16x64xf32>
    %cst_36 = arith.constant dense<0.000000e+00> : vector<16x64xf32>
    %95 = tpu.matmul %91, %81, %cst_36 {dimension_numbers = #tpu.dot_dimension_numbers<[1], [0], [0], [1], [0, 0, 1, 1], [], []>} : vector<16x32xbf16>, vector<32x64xbf16>, vector<16x64xf32> -> vector<16x64xf32>
    %96 = arith.addf %94, %95 : vector<16x64xf32>
    %97 = tpu.concatenate %93, %93 in 0 : vector<8x64xf32>, vector<8x64xf32> -> vector<16x64xf32>
    %98 = arith.addf %96, %97 : vector<16x64xf32>
    %cst_37 = arith.constant 0.999994993 : f32
    %99 = vector.broadcast %cst_37 : f32 to vector<16x64xf32>
    %100 = arith.mulf %98, %99 : vector<16x64xf32>
    %101 = vector.broadcast %83 : vector<1x64xf32> to vector<16x64xf32>
    %102 = arith.addf %100, %101 : vector<16x64xf32>
    %cst_38 = arith.constant 0.000000e+00 : f32
    %103 = vector.broadcast %cst_38 : f32 to vector<16x64xf32>
    %104 = arith.maximumf %102, %103 : vector<16x64xf32>
    %cst_39 = arith.constant 0.999994993 : f32
    %105 = vector.broadcast %cst_39 : f32 to vector<16x64xf32>
    %106 = arith.mulf %104, %105 : vector<16x64xf32>
    %cst_40 = arith.constant dense<0.000000e+00> : vector<16x16xf32>
    %107 = tpu.matmul %106, %84, %cst_40 {dimension_numbers = #tpu.dot_dimension_numbers<[1], [0], [0], [1], [0, 0, 1, 1], [], []>} : vector<16x64xf32>, vector<64x16xf32>, vector<16x16xf32> -> vector<16x16xf32>
    %108 = vector.broadcast %85 : vector<1x16xf32> to vector<16x16xf32>
    %109 = arith.addf %107, %108 : vector<16x16xf32>
    %c0_41 = arith.constant 0 : index
    %c0_42 = arith.constant 0 : index
    %110 = vector.load %arg14[%c0_41, %c0_42] : memref<16x20xf32, #tpu.memory_space<vmem>>, vector<16x20xf32>
    %cst_43 = arith.constant dense<0.000000e+00> : vector<16x20xf32>
    %111 = tpu.matmul %109, %110, %cst_43 {dimension_numbers = #tpu.dot_dimension_numbers<[1], [0], [0], [1], [0, 0, 1, 1], [], []>} : vector<16x16xf32>, vector<16x20xf32>, vector<16x20xf32> -> vector<16x20xf32>
    %c0_44 = arith.constant 0 : index
    %c0_45 = arith.constant 0 : index
    %112 = vector.load %arg15[%c0_44, %c0_45] : memref<4x20xf32, #tpu.memory_space<vmem>>, vector<4x20xf32>
    %cst_46 = arith.constant dense<0.000000e+00> : vector<16x20xf32>
    %113 = tpu.matmul %79, %112, %cst_46 {dimension_numbers = #tpu.dot_dimension_numbers<[1], [0], [0], [1], [0, 0, 1, 1], [], []>} : vector<16x4xf32>, vector<4x20xf32>, vector<16x20xf32> -> vector<16x20xf32>
    %114 = arith.addf %111, %113 : vector<16x20xf32>
    %cst_47 = arith.constant 0.999994993 : f32
    %115 = vector.broadcast %cst_47 : f32 to vector<16x20xf32>
    %116 = arith.mulf %114, %115 : vector<16x20xf32>
    %c0_48 = arith.constant 0 : index
    %c0_49 = arith.constant 0 : index
    %117 = vector.load %arg16[%c0_48, %c0_49] : memref<1x20xf32, #tpu.memory_space<vmem>>, vector<1x20xf32>
    %118 = vector.broadcast %117 : vector<1x20xf32> to vector<16x20xf32>
    %119 = arith.addf %116, %118 : vector<16x20xf32>
    %cst_50 = arith.constant 0.000000e+00 : f32
    %120 = vector.broadcast %cst_50 : f32 to vector<16x20xf32>
    %121 = arith.maximumf %119, %120 : vector<16x20xf32>
    %122 = vector.extract_strided_slice %121 {offsets = [0, 0], sizes = [8, 20], strides = [1, 1]} : vector<16x20xf32> to vector<8x20xf32>
    %123 = vector.extract_strided_slice %121 {offsets = [8, 0], sizes = [8, 20], strides = [1, 1]} : vector<16x20xf32> to vector<8x20xf32>
    %c0_51 = arith.constant 0 : index
    %c0_52 = arith.constant 0 : index
    %124 = vector.load %arg17[%c0_51, %c0_52] : memref<20x3xf32, #tpu.memory_space<vmem>>, vector<20x3xf32>
    %cst_53 = arith.constant dense<0.000000e+00> : vector<8x3xf32>
    %125 = tpu.matmul %122, %124, %cst_53 {dimension_numbers = #tpu.dot_dimension_numbers<[1], [0], [0], [1], [0, 0, 1, 1], [], []>} : vector<8x20xf32>, vector<20x3xf32>, vector<8x3xf32> -> vector<8x3xf32>
    %c0_54 = arith.constant 0 : index
    %c0_55 = arith.constant 0 : index
    %126 = vector.load %arg18[%c0_54, %c0_55] : memref<20x3xf32, #tpu.memory_space<vmem>>, vector<20x3xf32>
    %cst_56 = arith.constant dense<0.000000e+00> : vector<8x3xf32>
    %127 = tpu.matmul %123, %126, %cst_56 {dimension_numbers = #tpu.dot_dimension_numbers<[1], [0], [0], [1], [0, 0, 1, 1], [], []>} : vector<8x20xf32>, vector<20x3xf32>, vector<8x3xf32> -> vector<8x3xf32>
    %128 = arith.addf %125, %127 : vector<8x3xf32>
    %c0_57 = arith.constant 0 : index
    %c0_58 = arith.constant 0 : index
    %129 = vector.load %arg19[%c0_57, %c0_58] : memref<2x3xf32, #tpu.memory_space<vmem>>, vector<2x3xf32>
    %cst_59 = arith.constant dense<0.000000e+00> : vector<8x3xf32>
    %130 = tpu.matmul %3, %129, %cst_59 {dimension_numbers = #tpu.dot_dimension_numbers<[1], [0], [0], [1], [0, 0, 1, 1], [], []>} : vector<8x2xf32>, vector<2x3xf32>, vector<8x3xf32> -> vector<8x3xf32>
    %131 = arith.addf %128, %130 : vector<8x3xf32>
    %c0_60 = arith.constant 0 : index
    %c0_61 = arith.constant 0 : index
    %132 = vector.load %arg20[%c0_60, %c0_61] : memref<1x3xf32, #tpu.memory_space<vmem>>, vector<1x3xf32>
    %133 = vector.broadcast %132 : vector<1x3xf32> to vector<8x3xf32>
    %134 = arith.addf %131, %133 : vector<8x3xf32>
    %c0_62 = arith.constant 0 : index
    %c0_63 = arith.constant 0 : index
    %135 = vector.load %arg21[%c0_62, %c0_63] : memref<8x3xf32, #tpu.memory_space<vmem>>, vector<8x3xf32>
    tpu.vector_store %arg21[%c0_62, %c0_63], %134 {strides = array<i32>} : memref<8x3xf32, #tpu.memory_space<vmem>>, vector<8x3xf32>,
    return
  }
  func.func @transform_0(%arg0: i32) -> (i32, i32, i32) {
    %c0_i32 = arith.constant 0 : i32
    %c0_i32_0 = arith.constant 0 : i32
    %c0_i32_1 = arith.constant 0 : i32
    return %arg0, %c0_i32, %c0_i32_0 : i32, i32, i32
  }
  func.func @transform_1(%arg0: i32) -> (i32, i32) {
    %c0_i32 = arith.constant 0 : i32
    %c0_i32_0 = arith.constant 0 : i32
    return %arg0, %c0_i32 : i32, i32
  }
  func.func @transform_2(%arg0: i32) -> (i32, i32) {
    %c0_i32 = arith.constant 0 : i32
    %c0_i32_0 = arith.constant 0 : i32
    return %arg0, %c0_i32 : i32, i32
  }
  func.func @transform_3(%arg0: i32) -> (i32, i32) {
    %c0_i32 = arith.constant 0 : i32
    %c0_i32_0 = arith.constant 0 : i32
    return %arg0, %c0_i32 : i32, i32
  }
  func.func @transform_4(%arg0: i32) -> (i32, i32) {
    %c0_i32 = arith.constant 0 : i32
    %c0_i32_0 = arith.constant 0 : i32
    %c0_i32_1 = arith.constant 0 : i32
    return %c0_i32, %c0_i32_0 : i32, i32
  }
  func.func @transform_5(%arg0: i32) -> (i32, i32) {
    %c0_i32 = arith.constant 0 : i32
    %c0_i32_0 = arith.constant 0 : i32
    %c0_i32_1 = arith.constant 0 : i32
    return %c0_i32, %c0_i32_0 : i32, i32
  }
  func.func @transform_6(%arg0: i32) -> (i32, i32) {
    %c0_i32 = arith.constant 0 : i32
    %c0_i32_0 = arith.constant 0 : i32
    %c0_i32_1 = arith.constant 0 : i32
    return %c0_i32, %c0_i32_0 : i32, i32
  }
  func.func @transform_7(%arg0: i32) -> (i32, i32) {
    %c0_i32 = arith.constant 0 : i32
    %c0_i32_0 = arith.constant 0 : i32
    %c0_i32_1 = arith.constant 0 : i32
    return %c0_i32, %c0_i32_0 : i32, i32
  }
  func.func @transform_8(%arg0: i32) -> (i32, i32) {
    %c0_i32 = arith.constant 0 : i32
    %c0_i32_0 = arith.constant 0 : i32
    %c0_i32_1 = arith.constant 0 : i32
    return %c0_i32, %c0_i32_0 : i32, i32
  }
  func.func @transform_9(%arg0: i32) -> (i32, i32) {
    %c0_i32 = arith.constant 0 : i32
    %c0_i32_0 = arith.constant 0 : i32
    %c0_i32_1 = arith.constant 0 : i32
    return %c0_i32, %c0_i32_0 : i32, i32
  }
  func.func @transform_10(%arg0: i32) -> (i32, i32) {
    %c0_i32 = arith.constant 0 : i32
    %c0_i32_0 = arith.constant 0 : i32
    %c0_i32_1 = arith.constant 0 : i32
    return %c0_i32, %c0_i32_0 : i32, i32
  }
  func.func @transform_11(%arg0: i32) -> (i32, i32) {
    %c0_i32 = arith.constant 0 : i32
    %c0_i32_0 = arith.constant 0 : i32
    %c0_i32_1 = arith.constant 0 : i32
    return %c0_i32, %c0_i32_0 : i32, i32
  }
  func.func @transform_12(%arg0: i32) -> (i32, i32) {
    %c0_i32 = arith.constant 0 : i32
    %c0_i32_0 = arith.constant 0 : i32
    %c0_i32_1 = arith.constant 0 : i32
    return %c0_i32, %c0_i32_0 : i32, i32
  }
  func.func @transform_13(%arg0: i32) -> (i32, i32) {
    %c0_i32 = arith.constant 0 : i32
    %c0_i32_0 = arith.constant 0 : i32
    %c0_i32_1 = arith.constant 0 : i32
    return %c0_i32, %c0_i32_0 : i32, i32
  }
  func.func @transform_14(%arg0: i32) -> (i32, i32) {
    %c0_i32 = arith.constant 0 : i32
    %c0_i32_0 = arith.constant 0 : i32
    %c0_i32_1 = arith.constant 0 : i32
    return %c0_i32, %c0_i32_0 : i32, i32
  }
  func.func @transform_15(%arg0: i32) -> (i32, i32) {
    %c0_i32 = arith.constant 0 : i32
    %c0_i32_0 = arith.constant 0 : i32
    %c0_i32_1 = arith.constant 0 : i32
    return %c0_i32, %c0_i32_0 : i32, i32
  }
  func.func @transform_16(%arg0: i32) -> (i32, i32) {
    %c0_i32 = arith.constant 0 : i32
    %c0_i32_0 = arith.constant 0 : i32
    %c0_i32_1 = arith.constant 0 : i32
    return %c0_i32, %c0_i32_0 : i32, i32
  }
  func.func @transform_17(%arg0: i32) -> (i32, i32) {
    %c0_i32 = arith.constant 0 : i32
    %c0_i32_0 = arith.constant 0 : i32
    %c0_i32_1 = arith.constant 0 : i32
    return %c0_i32, %c0_i32_0 : i32, i32
  }
  func.func @transform_18(%arg0: i32) -> (i32, i32) {
    %c0_i32 = arith.constant 0 : i32
    %c0_i32_0 = arith.constant 0 : i32
    %c0_i32_1 = arith.constant 0 : i32
    return %c0_i32, %c0_i32_0 : i32, i32
  }
  func.func @transform_19(%arg0: i32) -> (i32, i32) {
    %c0_i32 = arith.constant 0 : i32
    %c0_i32_0 = arith.constant 0 : i32
    %c0_i32_1 = arith.constant 0 : i32
    return %c0_i32, %c0_i32_0 : i32, i32
  }
  func.func @transform_20(%arg0: i32) -> (i32, i32) {
    %c0_i32 = arith.constant 0 : i32
    %c0_i32_0 = arith.constant 0 : i32
    return %arg0, %c0_i32 : i32, i32
  }
}

</mosaic_0001>

<bundles_post_ra>
// kernel: tpu_custom_call.1
= control target key start
LH: loop header
LB: loop body
LE: loop exit
PB: predicated region body
PF: predicated region fallthrough
CT: control target
= control target key end

     0   :  { %vm93_vm0 = vcmask 261120   ;;  %v1261_v3 = vmov 2   ;;  %v1262_v4 = vmov 0   ;;  %v1263_v22 = vmov 3   ;;  %s1642_s0 = inlined_call_operand.vmem [shape: bf16[8,16,32], index: 0, kind: input, shape index: {}]   ;;  %s1643_s5 = inlined_call_operand.<no memory space> [shape: f32[1,1], index: 5, kind: input, shape index: {}]   ;;  %s1644_s1 = inlined_call_operand.vmem [shape: s32[8,7], index: 1, kind: input, shape index: {}]   ;;  %s1645_s4 = inlined_call_operand.vmem [shape: bf16[1,32], index: 4, kind: input, shape index: {}]   ;;  %s1646_s2 = inlined_call_operand.vmem [shape: s32[8,2], index: 2, kind: input, shape index: {}]   ;;  %s1647_s8 = inlined_call_operand.vmem [shape: bf16[32,64], index: 8, kind: input, shape index: {}]   ;;  %s1648_s7 = inlined_call_operand.vmem [shape: bf16[32,64], index: 7, kind: input, shape index: {}]   ;;  %s1649_s9 = inlined_call_operand.vmem [shape: bf16[32,64], index: 9, kind: input, shape index: {}]   ;;  %s1650_s6 = inlined_call_operand.vmem [shape: f32[14,4], index: 6, kind: input, shape index: {}]   ;;  %s1651_s10 = inlined_call_operand.vmem [shape: f32[1,64], index: 10, kind: input, shape index: {}]   ;;  %s1652_s11 = inlined_call_operand.vmem [shape: f32[64,16], index: 11, kind: input, shape index: {}]   ;;  %s1653_s12 = inlined_call_operand.vmem [shape: f32[1,16], index: 12, kind: input, shape index: {}]   ;;  %s1654_s14 = inlined_call_operand.vmem [shape: f32[4,20], index: 14, kind: input, shape index: {}]   ;;  %s1655_s13 = inlined_call_operand.vmem [shape: f32[16,20], index: 13, kind: input, shape index: {}]   ;;  %s1656_s15 = inlined_call_operand.vmem [shape: f32[1,20], index: 15, kind: input, shape index: {}]   ;;  %s1657_s17 = inlined_call_operand.vmem [shape: f32[20,3], index: 17, kind: input, shape index: {}]   ;;  %s1658_s16 = inlined_call_operand.vmem [shape: f32[20,3], index: 16, kind: input, shape index: {}]   ;;  %s1659_s18 = inlined_call_operand.vmem [shape: f32[2,3], index: 18, kind: input, shape index: {}]   ;;  %s1660_s3 = inlined_call_operand.vmem [shape: f32[8,2], index: 3, kind: input, shape index: {}]   ;;  %s1661_s19 = inlined_call_operand.vmem [shape: f32[1,3], index: 19, kind: input, shape index: {}]   ;;  %s1662_s20 = inlined_call_operand.vmem [shape: f32[8,3], index: 20, kind: output, shape index: {}]  }
   0x1   :  { %1664 = sst [smem:[#allocation3_spill]] %s1642_s0  ;;  %1242 = vset.pattern.permute.xlu0 %v1261_v3  ;;  %1244 = vset.pattern.permute.xlu1 %v1262_v4  ;;  %v1264_v23 = vmov 1   ;;  %vm291_vm1 = vcmask 1041409   ;;  %vm294_vm2 = vcmask 1042434   ;;  %v271_v42 = vlaneseq }
   0x2   :  { %1665 = sst [smem:[#allocation4_spill]] %s1643_s5  ;;  %1248 = vset.pattern.permute.xlu2 %v1262_v4  ;;  %vm297_vm3 = vcmask 1043459   ;;  %vm300_vm4 = vcmask 1044484   ;;  %vm303_vm5 = vcmask 1045509   ;;  %vm306_vm7 = vcmask 1046534   ;;  %s1267_s5 = smov 127  }
   0x3   :  { %1666 = sst [smem:[#allocation5_spill]] %s1644_s1  ;;  %v1432_v50 = vand.u32 127, %v271_v42  ;;  %vm309_vm9 = vcmask 1047559   ;;  %vm313_vm10 = vcmask 130048  }
   0x4   :  { %1667 = sst [smem:[#allocation6_spill]] %s1645_s4 }
   0x5   :  { %1668 = sst [smem:[#allocation7_spill]] %s1646_s2 }
   0x6   :  { %s1669_s23 = sld [smem:[#allocation3_spill]] }
   0x7   :  { %s1670_s28 = sld [smem:[#allocation4_spill]] }
   0x8   :  { %s1671_s27 = sld [smem:[#allocation5_spill]] }
   0x9   :  { %s1672_s2 = sld [smem:[#allocation6_spill]] }
   0xa   :  { %s1673_s21 = sld [smem:[#allocation7_spill]] }
   0xc   :  { %v1219_v0 = vld [vmem:[%s1669_s23] sm:$0xff]  ;;  %v1220_v1 = vld [vmem:[%s1669_s23 + $0x8] sm:$0xff]  ;;  %v1221_v2 = vld [vmem:[%s1669_s23 + $0x10] sm:$0xff] }
   0xd   :  { %v25_v5 = vstv %s1670_s28  ;;  %v1222_v6 = vld [vmem:[%s1669_s23 + $0x18] sm:$0xff]  ;;  %v1225_v7 = vld [vmem:[%s1669_s23 + $0x30] sm:$0xff]  ;;  %v98_v8 = vsel %vm93_vm0, %v1219_v0, 0  ;;  %v119_v9 = vsel %vm93_vm0, %v1220_v1, 0  ;;  %v140_v10 = vsel %vm93_vm0, %v1221_v2, 0  ;;  %v1223_v12 = vld [vmem:[%s1669_s23 + $0x20] sm:$0xff] }
   0xe   :  { %26 = vst [vmem:[#allocation2] sm:$0x1] %v25_v5  ;;  %v1226_v11 = vld [vmem:[%s1669_s23 + $0x38] sm:$0xff]  ;;  %v1224_v13 = vld [vmem:[%s1669_s23 + $0x28] sm:$0xff]  ;;  %107 = vmatpush.bf16.xpose.msra.mxu0 %v98_v8  ;;  %128 = vmatpush.bf16.xpose.msra.mxu1 %v119_v9  ;;  %v161_v14 = vsel %vm93_vm0, %v1222_v6, 0  ;;  %v224_v15 = vsel %vm93_vm0, %v1225_v7, 0 }
   0xf   :  { %149 = vmatpush.bf16.xpose.msra.mxu2 %v140_v10  ;;  %170 = vmatpush.bf16.xpose.msra.mxu3 %v161_v14  ;;  %v245_v16 = vsel %vm93_vm0, %v1226_v11, 0  ;;  %v182_v17 = vsel %vm93_vm0, %v1223_v12, 0  ;;  %v203_v18 = vsel %vm93_vm0, %v1224_v13, 0  ;;  %v1413_v19 = vld [vmem:[%s1671_s27] sm:$0xff]  ;;  %v1265_v10 = vmov 4  }
  0x10   :  { %v87_v20 = vld [vmem:[%s1672_s2] sm:$0x1]  ;;  %326 = vperm.xlu0 %1242, %v1413_v19   ;;  %274 = vperm.xlu1 %1244, %v1413_v19  }
  0x15   :  { %v260_v21 = vld [vmem:[#allocation2] sm:$0x1]  ;;  %1129 = vmatmul.msk.bf16.vlgmr.msra.gmra.mxu0 %vm93_vm0, %v87_v20  ;;  %1134 = vmatmul.msk.bf16.vlgmr.msra.gmra.mxu1 %vm93_vm0, %v87_v20 }
  0x16   :  { %191 = vmatpush.bf16.xpose.msrb.mxu0 %v182_v17  ;;  %212 = vmatpush.bf16.xpose.msrb.mxu1 %v203_v18  ;;  %1233 = vpush %v260_v21 }
  0x17   :  { %233 = vmatpush.bf16.xpose.msrb.mxu2 %v224_v15  ;;  %254 = vmatpush.bf16.xpose.msrb.mxu3 %v245_v16 }
  0x18   :  { %1139 = vmatmul.msk.bf16.vlgmr.msra.gmra.mxu2 %vm93_vm0, %v87_v20  ;;  %1144 = vmatmul.msk.bf16.vlgmr.msra.gmra.mxu3 %vm93_vm0, %v87_v20 }
  0x19   :  { %1243 = vset.pattern.permute.xlu0 %v1263_v22  ;;  %1245 = vset.pattern.permute.xlu1 %v1264_v23 }
  0x1a   :  { %330 = vperm.xlu0 %1243, %v1413_v19   ;;  %278 = vperm.xlu1 %1245, %v1413_v19  }
  0x1e   :  { %452 = vmatpush.bf16.msra.mxu0 %v1219_v0  ;;  %469 = vmatpush.bf16.msra.mxu1 %v1220_v1 }
  0x1f   :  { %486 = vmatpush.bf16.msra.mxu2 %v1221_v2  ;;  %503 = vmatpush.bf16.msra.mxu3 %v1222_v6 }
  0x22   :  { %1246 = vset.pattern.permute.xlu0 %v1265_v10 }
  0x23   :  { %347 = vperm.xlu0 %1246, %v1413_v19  }
  0x25   :  { %1149 = vmatmul.msk.bf16.vlgmr.msrb.gmra.mxu0 %vm93_vm0, %v87_v20  ;;  %1154 = vmatmul.msk.bf16.vlgmr.msrb.gmra.mxu1 %vm93_vm0, %v87_v20 }
  0x26   :  { %520 = vmatpush.bf16.msrb.mxu0 %v1223_v12  ;;  %537 = vmatpush.bf16.msrb.mxu1 %v1224_v13 }
  0x28   :  { %1159 = vmatmul.msk.bf16.vlgmr.msrb.gmra.mxu2 %vm93_vm0, %v87_v20  ;;  %1164 = vmatmul.msk.bf16.vlgmr.msrb.gmra.mxu3 %vm93_vm0, %v87_v20 }
  0x29   :  { %554 = vmatpush.bf16.msrb.mxu2 %v1225_v7  ;;  %571 = vmatpush.bf16.msrb.mxu3 %v1226_v11 }
  0x2b   :  { %1247 = vset.pattern.permute.xlu0 %v1262_v4 }
  0x47   :  { %s1234_s29 = spop %1233 }
  0x48   :  { %v262_v28 = vstv %s1234_s29 }
  0x82   :  { %v327_v33 = vpop.permute.xlu0 %326  ;;  %v275_v44 = vpop.permute.xlu1 %274 }
  0x83   :  { %vm328_vm6 = vcmp.ge.s32.totalorder %v1432_v50, %v327_v33  ;;  %vm276_vm12 = vcmp.ge.s32.totalorder %v1432_v50, %v275_v44 }
  0x8c   :  { %v331_v51 = vpop.permute.xlu0 %330  ;;  %v279_v0 = vpop.permute.xlu1 %278 }
  0x8d   :  { %vm332_vm8 = vcmp.le.s32.totalorder %v1432_v50, %v331_v51  ;;  %vm280_vm13 = vcmp.le.s32.totalorder %v1432_v50, %v279_v0 }
  0x8e   :  { %vm333_vm11 = vmand %vm328_vm6, %vm332_vm8  ;;  %vm415_vm6 = vcmask 1040384   ;;  %vm424_vm8 = vcmask 1041408  }
  0x8f   :  { %vm281_vm14 = vmand %vm276_vm12, %vm280_vm13 }
  0x92   :  { %v109_v24 = vpop.f32.mrf.mxu0  ;;  %v130_v25 = vpop.f32.mrf.mxu1 }
  0x93   :  { %v264_v31 = vadd.f32 %v262_v28, %v130_v25  ;;  %v263_v34 = vadd.f32 %v262_v28, %v109_v24  ;;  %v1266_v25 = vmov 0.0  }
  0x95   :  { %v290_v35 = vrot.slane %v264_v31, 7  ;;  %v348_v19 = vpop.permute.xlu0 %347 }
  0x96   :  { %vm349_vm15 = vcmp.eq.s32.totalorder %v1432_v50, %v348_v19 }
  0x97   :  { %v292_v45 = vsel %vm291_vm1, %v290_v35, %v263_v34 }
  0x9a   :  { %v111_v29 = vpop.f32.mrf.mxu0  ;;  %v132_v30 = vpop.f32.mrf.mxu1 }
  0x9b   :  { %v151_v26 = vpop.f32.mrf.mxu2  ;;  %v172_v27 = vpop.f32.mrf.mxu3 }
  0x9c   :  { %v265_v32 = vadd.f32 %v262_v28, %v151_v26  ;;  %v266_v36 = vadd.f32 %v262_v28, %v172_v27  ;;  %v1453_v26 = vsel %vm349_vm15, 1.0, %v1266_v25  ;;  %v85_v27 = vld [vmem:[%s1673_s21] sm:$0xff] }
  0x9d   :  { %580 = vperm.xlu0 %1247, %v85_v27   ;;  %v377_v29 = vrot.slane %v1453_v26, 2  ;;  %v378_v33 = vrot.slane %v1453_v26, 3  ;;  %v399_v35 = vperm.slane %v1453_v26, 0 }
  0x9e   :  { %v293_v39 = vrot.slane %v265_v32, 6  ;;  %v296_v46 = vrot.slane %v266_v36, 5 }
  0xa0   :  { %v295_v48 = vsel %vm294_vm2, %v293_v39, %v292_v45  ;;  %v401_v39 = vperm.slane %v377_v29, 0  ;;  %v1230_v29 = vld [vmem:[%s1647_s8 + $0x8] sm:$0xff] }
  0xa1   :  { %v298_v52 = vsel %vm297_vm3, %v296_v46, %v295_v48 }
  0xa2   :  { %v193_v40 = vpop.f32.mrf.mxu0  ;;  %v214_v41 = vpop.f32.mrf.mxu1 }
  0xa3   :  { %v153_v37 = vpop.f32.mrf.mxu2  ;;  %v174_v38 = vpop.f32.mrf.mxu3  ;;  %v267_v43 = vadd.f32 %v262_v28, %v193_v40  ;;  %v268_v47 = vadd.f32 %v262_v28, %v214_v41 }
  0xa5   :  { %v299_v49 = vrot.slane %v267_v43, 4  ;;  %v302_v53 = vrot.slane %v268_v47, 3  ;;  %v402_v43 = vperm.slane %v378_v33, 0  ;;  %v1227_v33 = vld [vmem:[%s1648_s7] sm:$0xff] }
  0xa7   :  { %v301_v56 = vsel %vm300_vm4, %v299_v49, %v298_v52 }
  0xa8   :  { %v304_v63 = vsel %vm303_vm5, %v302_v53, %v301_v56 }
  0xaa   :  { %v195_v59 = vpop.f32.mrf.mxu0  ;;  %v216_v60 = vpop.f32.mrf.mxu1 }
  0xab   :  { %v235_v54 = vpop.f32.mrf.mxu2  ;;  %v256_v55 = vpop.f32.mrf.mxu3 }
  0xac   :  { %v269_v57 = vadd.f32 %v262_v28, %v235_v54  ;;  %v270_v58 = vadd.f32 %v262_v28, %v256_v55  ;;  %v376_v28 = vrot.slane %v1453_v26, 1 }
  0xae   :  { %v305_v61 = vrot.slane %v269_v57, 2  ;;  %v308_v62 = vrot.slane %v270_v58, 1  ;;  %v400_v38 = vperm.slane %v376_v28, 0 }
  0xb0   :  { %v307_v1 = vsel %vm306_vm7, %v305_v61, %v304_v63  ;;  %v379_v61 = vrot.slane %v1453_v26, 4 }
  0xb1   :  { %v310_v2 = vsel %vm309_vm9, %v308_v62, %v307_v1  ;;  %v380_v1 = vrot.slane %v1453_v26, 5 }
  0xb2   :  { %v334_v3 = vsel %vm333_vm11, %v310_v2, -1e+30  ;;  %v312_v8 = vsel %vm281_vm14, %v310_v2, -1e+30  ;;  %v381_v2 = vrot.slane %v1453_v26, 6  ;;  %vm600_vm11 = vcmask 1045504  }
  0xb3   :  { %v237_v5 = vpop.f32.mrf.mxu2  ;;  %v258_v6 = vpop.f32.mrf.mxu3  ;;  %v335_v7 = vsel %vm313_vm10, %v334_v3, -inf  ;;  %v314_v9 = vsel %vm313_vm10, %v312_v8, -inf }
  0xb4   :  { %336 = vmax.xlane.f32.xlu2 %v335_v7 }
  0xbc   :  { %315 = vmax.xlane.f32.xlu2 %v314_v9  ;;  %v403_v9 = vperm.slane %v379_v61, 0 }
 0x127   :  { %v337_v11 = vpop.xlane.xlu2 %336 }
 0x128   :  { %v338_v12 = vsub.f32 %v334_v3, %v337_v11 }
 0x12a   :  { %v339_v13 = vmul.f32 1.442695, %v338_v12 }
 0x12c   :  { %1253 = vpow2.f32 %v339_v13 }
 0x12f   :  { %v316_v14 = vpop.xlane.xlu2 %315 }
 0x130   :  { %v317_v15 = vsub.f32 %v312_v8, %v316_v14  ;;  %v382_v8 = vrot.slane %v1453_v26, 7  ;;  %v404_v14 = vperm.slane %v380_v1, 0 }
 0x132   :  { %v1254_v16 = vpop.eup %1253  ;;  %v318_v17 = vmul.f32 1.442695, %v317_v15  ;;  %v405_v15 = vperm.slane %v381_v2, 0 }
 0x133   :  { %v341_v18 = vsel %vm313_vm10, %v1254_v16, 0.0 }
 0x134   :  { %1255 = vpow2.f32 %v318_v17  ;;  %342 = vadd.xlane.f32.xlu1 %v341_v18 }
 0x13a   :  { %v1256_v20 = vpop.eup %1255 }
 0x13b   :  { %v320_v21 = vsel %vm313_vm10, %v1256_v20, 0.0 }
 0x13c   :  { %321 = vadd.xlane.f32.xlu2 %v320_v21 }
 0x154   :  { %577 = vrot.lane.b32.xlu2 %v85_v27, %s1267_s5 }
 0x1a7   :  { %v343_v22 = vpop.xlane.xlu1 %342 }
 0x1a8   :  { %1257 = vrcp.f32 %v343_v22 }
 0x1ae   :  { %v1258_v4 = vpop.eup %1257 }
 0x1af   :  { %v322_v23 = vpop.xlane.xlu2 %321  ;;  %v1450_v24 = vmul.f32 %v1258_v4, %v1254_v16 }
 0x1b0   :  { %1259 = vrcp.f32 %v322_v23 }
 0x1b1   :  { %v368_v30 = vrot.slane %v1450_v24, 1  ;;  %v369_v31 = vrot.slane %v1450_v24, 2  ;;  %v370_v32 = vrot.slane %v1450_v24, 3  ;;  %v383_v37 = vperm.slane %v1450_v24, 0 }
 0x1b2   :  { %v371_v60 = vrot.slane %v1450_v24, 4  ;;  %v372_v63 = vrot.slane %v1450_v24, 5  ;;  %v373_v0 = vrot.slane %v1450_v24, 6  ;;  %v374_v3 = vrot.slane %v1450_v24, 7 }
 0x1b3   :  { %v384_v40 = vperm.slane %v368_v30, 0  ;;  %v385_v41 = vperm.slane %v369_v31, 0  ;;  %v386_v42 = vperm.slane %v370_v32, 0  ;;  %v1228_v30 = vld [vmem:[%s1648_s7 + $0x8] sm:$0xff]  ;;  %v1229_v32 = vld [vmem:[%s1647_s8] sm:$0xff] }
 0x1b4   :  { %v387_v5 = vperm.slane %v371_v60, 0  ;;  %v388_v12 = vperm.slane %v372_v63, 0  ;;  %v389_v13 = vperm.slane %v373_v0, 0  ;;  %v390_v16 = vperm.slane %v374_v3, 0  ;;  %v1232_v31 = vld [vmem:[%s1649_s9 + $0x8] sm:$0xff] }
 0x1b6   :  { %v1260_v34 = vpop.eup %1259 }
 0x1b7   :  { %v324_v36 = vmul.f32 %v1260_v34, %v1256_v20  ;;  %v406_v20 = vperm.slane %v382_v8, 0 }
 0x1b9   :  { %v416_v44 = vsel %vm415_vm6, %v324_v36, %v383_v37  ;;  %v353_v45 = vrot.slane %v324_v36, 1  ;;  %v354_v46 = vrot.slane %v324_v36, 2  ;;  %v355_v47 = vrot.slane %v324_v36, 3  ;;  %v1231_v37 = vld [vmem:[%s1649_s9] sm:$0xff] }
 0x1ba   :  { %v425_v48 = vsel %vm424_vm8, %v416_v44, %v399_v35  ;;  %v356_v62 = vrot.slane %v324_v36, 4  ;;  %v357_v6 = vrot.slane %v324_v36, 5  ;;  %v358_v7 = vrot.slane %v324_v36, 6 }
 0x1bb   :  { %v433_v49 = vpack.c.bf16 %v425_v48, %v425_v48  ;;  %v417_v51 = vsel %vm415_vm6, %v353_v45, %v384_v40  ;;  %v418_v52 = vsel %vm415_vm6, %v354_v46, %v385_v41  ;;  %v419_v53 = vsel %vm415_vm6, %v355_v47, %v386_v42  ;;  %v578_v46 = vpop.permute.xlu2 %577  ;;  %v592_v47 = vld [vmem:[%s1650_s6 + $0x8] sm:$0x3f] }
 0x1bc   :  { %v426_v54 = vsel %vm424_vm8, %v417_v51, %v400_v38  ;;  %v427_v55 = vsel %vm424_vm8, %v418_v52, %v401_v39  ;;  %v428_v56 = vsel %vm424_vm8, %v419_v53, %v402_v43  ;;  %v359_v10 = vrot.slane %v324_v36, 7  ;;  %583 = vperm.xlu2 %1248, %v578_v46  }
 0x1bd   :  { %1166 = vmatmul.msk.bf16.vlgmr.msra.gmra.mxu0 %vm313_vm10, %v433_v49  ;;  %v434_v57 = vpack.c.bf16 %v426_v54, %v426_v54  ;;  %v435_v58 = vpack.c.bf16 %v427_v55, %v427_v55  ;;  %v436_v59 = vpack.c.bf16 %v428_v56, %v428_v56  ;;  %v420_v11 = vsel %vm415_vm6, %v356_v62, %v387_v5  ;;  %v591_v49 = vld [vmem:[%s1650_s6] sm:$0xff] }
 0x1be   :  { %v421_v17 = vsel %vm415_vm6, %v357_v6, %v388_v12  ;;  %v422_v18 = vsel %vm415_vm6, %v358_v7, %v389_v13  ;;  %v429_v21 = vsel %vm424_vm8, %v420_v11, %v403_v9  ;;  %v423_v22 = vsel %vm415_vm6, %v359_v10, %v390_v16  ;;  %1176 = vmatpush.msk.msra.mxu0 %vm600_vm11, %v592_v47 }
 0x1bf   :  { %1167 = vmatmul.msk.bf16.vlgmr.msra.gmra.mxu1 %vm313_vm10, %v434_v57  ;;  %1168 = vmatmul.msk.bf16.vlgmr.msra.gmra.mxu2 %vm313_vm10, %v435_v58  ;;  %v430_v19 = vsel %vm424_vm8, %v421_v17, %v404_v14  ;;  %v431_v4 = vsel %vm424_vm8, %v422_v18, %v405_v15  ;;  %v437_v23 = vpack.c.bf16 %v429_v21, %v429_v21 }
 0x1c0   :  { %1169 = vmatmul.msk.bf16.vlgmr.msra.gmra.mxu3 %vm313_vm10, %v436_v59  ;;  %v432_v24 = vsel %vm424_vm8, %v423_v22, %v406_v20  ;;  %v438_v26 = vpack.c.bf16 %v430_v19, %v430_v19  ;;  %v439_v27 = vpack.c.bf16 %v431_v4, %v431_v4  ;;  %867 = vmatpush.bf16.msra.mxu2 %v1230_v29 }
 0x1c1   :  { %v440_v28 = vpack.c.bf16 %v432_v24, %v432_v24  ;;  %896 = vmatpush.bf16.msra.mxu3 %v1228_v30  ;;  %839 = vmatpush.bf16.msra.mxu1 %v1232_v31 }
 0x1c2   :  { %619 = vmatpush.msra.mxu0 %v591_v49 }
 0x1c4   :  { %868 = vmatpush.bf16.msra.mxu2 %v1229_v32 }
 0x1c5   :  { %897 = vmatpush.bf16.msra.mxu3 %v1227_v33  ;;  %840 = vmatpush.bf16.msra.mxu1 %v1231_v37 }
 0x1cd   :  { %1170 = vmatmul.msk.bf16.vlgmr.msrb.gmra.mxu0 %vm313_vm10, %v437_v23 }
 0x1cf   :  { %1171 = vmatmul.msk.bf16.vlgmr.msrb.gmra.mxu1 %vm313_vm10, %v438_v26  ;;  %1172 = vmatmul.msk.bf16.vlgmr.msrb.gmra.mxu2 %vm313_vm10, %v439_v27 }
 0x1d0   :  { %1173 = vmatmul.msk.bf16.vlgmr.msrb.gmra.mxu3 %vm313_vm10, %v440_v28 }
 0x23a   :  { %v454_v34 = vpop.f32.mrf.mxu0 }
 0x23b   :  { %v681_v35 = vrot.slane %v454_v34, 1  ;;  %v779_v36 = vpack.c.bf16 %v454_v34, %v454_v34  ;;  %v657_v39 = vrot.slane %v454_v34, 2 }
 0x23c   :  { %v471_v38 = vpop.f32.mrf.mxu1 }
 0x23d   :  { %v697_v40 = vmul.f32 %v681_v35, %v454_v34  ;;  %v658_v41 = vrot.slane %v471_v38, 2  ;;  %v795_v42 = vunpack.c.l.b16 %v779_v36  ;;  %v682_v43 = vrot.slane %v471_v38, 1 }
 0x23e   :  { %v752_v44 = vrot.slane %v471_v38, 7  ;;  %v780_v45 = vpack.c.bf16 %v471_v38, %v471_v38  ;;  %v673_v52 = vmul.f32 %v657_v39, %v454_v34  ;;  %v765_v53 = vsel %vm291_vm1, %v471_v38, %v681_v35 }
 0x23f   :  { %v674_v48 = vmul.f32 %v658_v41, %v471_v38  ;;  %v736_v54 = vrot.slane %v697_v40, 1  ;;  %v803_v55 = vrot.slane %v795_v42, 2  ;;  %v698_v56 = vmul.f32 %v682_v43, %v471_v38 }
 0x240   :  { %v796_v51 = vunpack.c.l.b16 %v780_v45  ;;  %v753_v57 = vsel %vm291_vm1, %v752_v44, %v454_v34 }
 0x241   :  { %v713_v60 = vrot.slane %v674_v48, 7  ;;  %v737_v21 = vsel %vm291_vm1, %v698_v56, %v736_v54 }
 0x242   :  { %v456_v58 = vpop.f32.mrf.mxu0  ;;  %v488_v59 = vpop.f32.mrf.mxu2  ;;  %v804_v1 = vrot.slane %v796_v51, 1 }
 0x243   :  { %v659_v61 = vrot.slane %v488_v59, 2  ;;  %v683_v62 = vrot.slane %v488_v59, 1  ;;  %v754_v63 = vrot.slane %v488_v59, 6  ;;  %v505_v0 = vpop.f32.mrf.mxu3  ;;  %v766_v2 = vrot.slane %v488_v59, 7 }
 0x244   :  { %v781_v3 = vpack.c.bf16 %v488_v59, %v488_v59  ;;  %v660_v5 = vrot.slane %v505_v0, 2  ;;  %v473_v6 = vpop.f32.mrf.mxu1  ;;  %v684_v10 = vrot.slane %v505_v0, 1  ;;  %v756_v14 = vrot.slane %v505_v0, 5 }
 0x245   :  { %v675_v7 = vmul.f32 %v659_v61, %v488_v59  ;;  %v699_v8 = vmul.f32 %v683_v62, %v488_v59  ;;  %v755_v9 = vsel %vm294_vm2, %v754_v63, %v753_v57  ;;  %v767_v11 = vsel %vm294_vm2, %v766_v2, %v765_v53 }
 0x246   :  { %v797_v12 = vunpack.c.l.b16 %v781_v3  ;;  %v676_v13 = vmul.f32 %v660_v5, %v505_v0  ;;  %v700_v17 = vmul.f32 %v684_v10, %v505_v0  ;;  %v768_v18 = vrot.slane %v505_v0, 6 }
 0x247   :  { %v715_v15 = vrot.slane %v675_v7, 6  ;;  %v738_v16 = vrot.slane %v699_v8, 7  ;;  %v714_v20 = vsel %vm291_vm1, %v713_v60, %v673_v52  ;;  %v782_v19 = vpack.c.bf16 %v505_v0, %v505_v0 }
 0x248   :  { %v717_v22 = vrot.slane %v676_v13, 5  ;;  %v805_v4 = vsel %vm291_vm1, %v804_v1, %v803_v55  ;;  %v740_v26 = vrot.slane %v700_v17, 6  ;;  %v757_v28 = vsel %vm297_vm3, %v756_v14, %v755_v9 }
 0x249   :  { %v716_v23 = vsel %vm294_vm2, %v715_v15, %v714_v20  ;;  %v739_v24 = vsel %vm294_vm2, %v738_v16, %v737_v21  ;;  %v806_v27 = vsel %vm294_vm2, %v797_v12, %v805_v4  ;;  %v769_v29 = vsel %vm297_vm3, %v768_v18, %v767_v11 }
 0x24a   :  { %v798_v30 = vunpack.c.l.b16 %v782_v19  ;;  %v490_v31 = vpop.f32.mrf.mxu2  ;;  %v522_v32 = vpop.f32.mrf.mxu0  ;;  %v718_v33 = vsel %vm297_vm3, %v717_v22, %v716_v23  ;;  %v741_v34 = vsel %vm297_vm3, %v740_v26, %v739_v24  ;;  %vm593_vm2 = vcmask 113664  }
 0x24b   :  { %v507_v35 = vpop.f32.mrf.mxu3  ;;  %v661_v36 = vrot.slane %v522_v32, 2  ;;  %v685_v37 = vrot.slane %v522_v32, 1  ;;  %v758_v39 = vrot.slane %v522_v32, 4  ;;  %v770_v40 = vrot.slane %v522_v32, 5 }
 0x24c   :  { %v807_v38 = vrot.slane %v798_v30, 7  ;;  %v783_v41 = vpack.c.bf16 %v522_v32, %v522_v32  ;;  %v539_v42 = vpop.f32.mrf.mxu1 }
 0x24d   :  { %v677_v43 = vmul.f32 %v661_v36, %v522_v32  ;;  %v701_v44 = vmul.f32 %v685_v37, %v522_v32  ;;  %v662_v45 = vrot.slane %v539_v42, 2  ;;  %v686_v46 = vrot.slane %v539_v42, 1 }
 0x24e   :  { %v808_v47 = vsel %vm297_vm3, %v807_v38, %v806_v27  ;;  %v799_v48 = vunpack.c.l.b16 %v783_v41  ;;  %v760_v49 = vrot.slane %v539_v42, 3  ;;  %v772_v51 = vrot.slane %v539_v42, 4 }
 0x24f   :  { %v719_v52 = vrot.slane %v677_v43, 4  ;;  %v742_v53 = vrot.slane %v701_v44, 5  ;;  %v678_v54 = vmul.f32 %v662_v45, %v539_v42  ;;  %v702_v55 = vmul.f32 %v686_v46, %v539_v42 }
 0x250   :  { %v809_v56 = vrot.slane %v799_v48, 6  ;;  %v784_v57 = vpack.c.bf16 %v539_v42, %v539_v42  ;;  %v759_v58 = vsel %vm300_vm4, %v758_v39, %v757_v28  ;;  %v771_v59 = vsel %vm300_vm4, %v770_v40, %v769_v29 }
 0x251   :  { %v721_v60 = vrot.slane %v678_v54, 3  ;;  %v744_v61 = vrot.slane %v702_v55, 4  ;;  %v761_v62 = vsel %vm303_vm5, %v760_v49, %v759_v58  ;;  %v773_v63 = vsel %vm303_vm5, %v772_v51, %v771_v59  ;;  %v647_v49 = vld [vmem:[%s1652_s11 + $0x38] sm:$0xff]  ;;  %v646_v51 = vld [vmem:[%s1652_s11 + $0x30] sm:$0xff]  ;;  %v644_v54 = vld [vmem:[%s1652_s11 + $0x20] sm:$0xff] }
 0x252   :  { %v800_v0 = vunpack.c.l.b16 %v784_v57  ;;  %v524_v1 = vpop.f32.mrf.mxu0  ;;  %v556_v2 = vpop.f32.mrf.mxu2  ;;  %v810_v3 = vsel %vm300_vm4, %v809_v56, %v808_v47  ;;  %v720_v5 = vsel %vm300_vm4, %v719_v52, %v718_v33  ;;  %v743_v6 = vsel %vm300_vm4, %v742_v53, %v741_v34  ;;  %935 = vmatpush.msrb.mxu0 %v647_v49  ;;  %v645_v52 = vld [vmem:[%s1652_s11 + $0x28] sm:$0xff]  ;;  %v643_v56 = vld [vmem:[%s1652_s11 + $0x18] sm:$0xff]  ;;  %v642_v57 = vld [vmem:[%s1652_s11 + $0x10] sm:$0xff] }
 0x253   :  { %v663_v7 = vrot.slane %v556_v2, 2  ;;  %v687_v8 = vrot.slane %v556_v2, 1  ;;  %v774_v9 = vrot.slane %v556_v2, 3  ;;  %v785_v10 = vpack.c.bf16 %v556_v2, %v556_v2  ;;  %v573_v11 = vpop.f32.mrf.mxu3  ;;  %v581_v47 = vpop.permute.xlu0 %580  ;;  %v1252_v49 = vld [vmem:[%s1661_s19] ss:$0 sm:$0xff] }
 0x254   :  { %v811_v12 = vrot.slane %v800_v0, 5  ;;  %v664_v13 = vrot.slane %v573_v11, 2  ;;  %v688_v14 = vrot.slane %v573_v11, 1  ;;  %v786_v15 = vpack.c.bf16 %v573_v11, %v573_v11  ;;  %v541_v16 = vpop.f32.mrf.mxu1  ;;  %936 = vmatpush.msrb.mxu0 %v646_v51  ;;  %v584_v53 = vpop.permute.xlu2 %583  ;;  %v1249_v0 = vld [vmem:[%s1651_s10] ss:$0 sm:$0xff] }
 0x255   :  { %v679_v17 = vmul.f32 %v663_v7, %v556_v2  ;;  %v703_v18 = vmul.f32 %v687_v8, %v556_v2  ;;  %v801_v20 = vunpack.c.l.b16 %v785_v10  ;;  %v762_v21 = vsel %vm306_vm7, %v663_v7, %v761_v62  ;;  %v950_v16 = vld [vmem:[%s1655_s13] sm:$0xff] }
 0x256   :  { %v680_v22 = vmul.f32 %v664_v13, %v573_v11  ;;  %v704_v19 = vmul.f32 %v688_v14, %v573_v11  ;;  %v802_v4 = vunpack.c.l.b16 %v786_v15  ;;  %v763_v23 = vsel %vm309_vm9, %v688_v14, %v762_v21  ;;  %937 = vmatpush.msrb.mxu0 %v645_v52  ;;  %v952_v14 = vld [vmem:[%s1654_s14] sm:$0xf]  ;;  %v951_v15 = vld [vmem:[%s1655_s13 + $0x8] sm:$0xff] }
 0x257   :  { %v723_v24 = vrot.slane %v679_v17, 2  ;;  %v746_v26 = vrot.slane %v703_v18, 3  ;;  %v813_v27 = vrot.slane %v801_v20, 4  ;;  %v775_v28 = vsel %vm306_vm7, %v774_v9, %v773_v63  ;;  %1007 = vmatpush.msrb.mxu2 %v951_v15  ;;  %v1250_v20 = vld [vmem:[%s1653_s12] ss:$0 sm:$0xff] }
 0x258   :  { %v725_v29 = vrot.slane %v680_v22, 1  ;;  %v748_v30 = vrot.slane %v704_v19, 2  ;;  %v815_v31 = vrot.slane %v802_v4, 3  ;;  %v776_v32 = vsel %vm309_vm9, %v664_v13, %v775_v28  ;;  %938 = vmatpush.msrb.mxu0 %v644_v54  ;;  %v1085_v28 = vld [vmem:[%s1659_s18] sm:$0x3] }
 0x259   :  { %v778_v33 = vpack.c.bf16 %v776_v32, %v763_v23  ;;  %v812_v34 = vsel %vm303_vm5, %v811_v12, %v810_v3  ;;  %v722_v35 = vsel %vm303_vm5, %v721_v60, %v720_v5  ;;  %v745_v36 = vsel %vm303_vm5, %v744_v61, %v743_v6  ;;  %1008 = vmatpush.msrb.mxu2 %v950_v16  ;;  %v1031_v23 = vld [vmem:[%s1657_s17 + $0x10] sm:$0xf] }
 0x25a   :  { %v558_v37 = vpop.f32.mrf.mxu2  ;;  %v814_v38 = vsel %vm306_vm7, %v813_v27, %v812_v34  ;;  %v724_v39 = vsel %vm306_vm7, %v723_v24, %v722_v35  ;;  %v747_v40 = vsel %vm306_vm7, %v746_v26, %v745_v36  ;;  %vm585_vm1 = vcmp.eq.s32.totalorder %v1432_v50, %v581_v47  ;;  %939 = vmatpush.msrb.mxu0 %v643_v56  ;;  %v1030_v24 = vld [vmem:[%s1657_s17 + $0x8] sm:$0xff]  ;;  %v1029_v26 = vld [vmem:[%s1657_s17] sm:$0xff]  ;;  %v1028_v27 = vld [vmem:[%s1658_s16 + $0x10] sm:$0xf] }
 0x25b   :  { %1196 = vmatmul.msk.bf16.vlgmr.msra.gmra.mxu2 %vm93_vm0, %v778_v33  ;;  %v575_v41 = vpop.f32.mrf.mxu3  ;;  %v816_v42 = vsel %vm309_vm9, %v815_v31, %v814_v38  ;;  %v726_v43 = vsel %vm309_vm9, %v725_v29, %v724_v39  ;;  %v749_v44 = vsel %vm309_vm9, %v748_v30, %v747_v40  ;;  %v1174_v48 = vsel %vm585_vm1, 1.0, %v1266_v25  ;;  %v1027_v29 = vld [vmem:[%s1658_s16 + $0x8] sm:$0xff]  ;;  %v1026_v30 = vld [vmem:[%s1658_s16] sm:$0xff] }
 0x25c   :  { %v817_v45 = vpack.c.b16 %v816_v42, %v816_v42  ;;  %v751_v46 = vpack.c.bf16 %v749_v44, %v726_v43  ;;  %1177 = vmatmul.msk.f32.vlgmr.msra.gmra.mxu0 %vm593_vm2, %v1174_v48  ;;  %vm920_vm3 = vcmask 523264   ;;  %vm960_vm4 = vcmask 1043456   ;;  %v86_v31 = vld [vmem:[%s1660_s3] sm:$0xff] }
 0x25d   :  { %940 = vmatpush.msrb.mxu0 %v642_v57  ;;  %1208 = vmatpush.msk.msrb.mxu1 %vm960_vm4, %v952_v14  ;;  %vm953_vm5 = vcmask 31744   ;;  %vm1086_vm7 = vcmask 15360   ;;  %v1251_v38 = vld [vmem:[%s1656_s15] ss:$0 sm:$0xff]  ;;  %vm1032_vm9 = vcmask 162816  }
 0x25e   :  { %1187 = vmatmul.msk.bf16.vlgmr.msra.gmra.mxu1 %vm93_vm0, %v817_v45  ;;  %1205 = vmatmul.msk.bf16.vlgmr.msra.gmra.mxu3 %vm93_vm0, %v751_v46  ;;  %vm586_vm0 = vcmp.eq.s32.totalorder %v1432_v50, %v584_v53  ;;  %v641_v50 = vld [vmem:[%s1652_s11 + $0x8] sm:$0xff] }
 0x25f   :  { %v1175_v55 = vsel %vm586_vm0, 1.0, %v1266_v25  ;;  %v640_v25 = vld [vmem:[%s1652_s11] sm:$0xff]  ;;  %941 = vmatpush.msrb.mxu0 %v641_v50  ;;  %1213 = vmatpush.msk.msrb.mxu3 %vm960_vm4, %v1031_v23 }
 0x261   :  { %942 = vmatpush.msrb.mxu0 %v640_v25  ;;  %1053 = vmatpush.msrb.mxu3 %v1030_v24 }
 0x263   :  { %1054 = vmatpush.msrb.mxu3 %v1029_v26  ;;  %1217 = vmatpush.msk.msra.mxu0 %vm424_vm8, %v1085_v28 }
 0x264   :  { %1178 = vmatmul.msk.f32.gmra.mxu0 %vm593_vm2, %v1175_v55 }
 0x265   :  { %1215 = vmatpush.msk.msra.mxu3 %vm960_vm4, %v1028_v27 }
 0x267   :  { %1079 = vmatpush.msra.mxu3 %v1027_v29 }
 0x269   :  { %1080 = vmatpush.msra.mxu3 %v1026_v30 }
 0x2d9   :  { %v621_v17 = vpop.f32.mrf.mxu0 }
 0x2da   :  { %1209 = vmatmul.msk.f32.vlgmr.msrb.gmra.mxu1 %vm953_vm5, %v621_v17 }
 0x2db   :  { %v842_v58 = vpop.f32.mrf.mxu1 }
 0x2de   :  { %v870_v59 = vpop.f32.mrf.mxu2 }
 0x2e1   :  { %v899_v60 = vpop.f32.mrf.mxu3  ;;  %v624_v18 = vpop.f32.mrf.mxu0 }
 0x2e2   :  { %v900_v61 = vadd.f32 %v899_v60, %v870_v59  ;;  %1210 = vmatmul.msk.f32.gmra.mxu1 %vm953_vm5, %v624_v18 }
 0x2e3   :  { %v844_v62 = vpop.f32.mrf.mxu1 }
 0x2e4   :  { %v904_v63 = vadd.f32 %v900_v61, %v842_v58 }
 0x2e6   :  { %v906_v1 = vmul.f32 0.999995, %v904_v63  ;;  %v872_v3 = vpop.f32.mrf.mxu2 }
 0x2e8   :  { %v911_v2 = vadd.f32 %v1249_v0, %v906_v1 }
 0x2e9   :  { %v901_v5 = vpop.f32.mrf.mxu3 }
 0x2ea   :  { %v913_v6 = vmax.f32 %v911_v2, 0.0  ;;  %v902_v7 = vadd.f32 %v901_v5, %v872_v3 }
 0x2ec   :  { %v915_v8 = vmul.f32 0.999995, %v913_v6  ;;  %v905_v9 = vadd.f32 %v902_v7, %v842_v58 }
 0x2ee   :  { %v907_v10 = vmul.f32 0.999995, %v905_v9  ;;  %1206 = vmatmul.msk.f32.vlgmr.msrb.gmra.mxu0 %vm920_vm3, %v915_v8 }
 0x2f0   :  { %v912_v11 = vadd.f32 %v1249_v0, %v907_v10 }
 0x2f2   :  { %v914_v12 = vmax.f32 %v912_v11, 0.0 }
 0x2f4   :  { %v916_v13 = vmul.f32 0.999995, %v914_v12 }
 0x2f6   :  { %1207 = vmatmul.msk.f32.gmra.mxu0 %vm920_vm3, %v916_v13 }
 0x2fe   :  { %1218 = vmatmul.msk.f32.vlgmr.msra.gmra.mxu0 %vm1086_vm7, %v86_v31 }
 0x357   :  { %v981_v32 = vpop.f32.mrf.mxu1 }
 0x35f   :  { %v984_v34 = vpop.f32.mrf.mxu1 }
 0x36b   :  { %v944_v21 = vpop.f32.mrf.mxu0 }
 0x36c   :  { %v945_v22 = vadd.f32 %v1250_v20, %v944_v21 }
 0x36e   :  { %1211 = vmatmul.msk.f32.vlgmr.msrb.gmra.mxu2 %vm313_vm10, %v945_v22 }
 0x373   :  { %v947_v19 = vpop.f32.mrf.mxu0 }
 0x374   :  { %v948_v4 = vadd.f32 %v1250_v20, %v947_v19 }
 0x376   :  { %1212 = vmatmul.msk.f32.gmra.mxu2 %vm313_vm10, %v948_v4  ;;  %vm1119_vm10 = vcmask 23552  }
 0x37b   :  { %v1110_v47 = vpop.f32.mrf.mxu0 }
 0x3f1   :  { %v1010_v33 = vpop.f32.mrf.mxu2 }
 0x3f2   :  { %v1011_v37 = vadd.f32 %v1010_v33, %v981_v32 }
 0x3f4   :  { %v1016_v41 = vmul.f32 0.999995, %v1011_v37 }
 0x3f6   :  { %v1022_v43 = vadd.f32 %v1251_v38, %v1016_v41 }
 0x3f8   :  { %v1024_v44 = vmax.f32 %v1022_v43, 0.0 }
 0x3f9   :  { %v1013_v35 = vpop.f32.mrf.mxu2 }
 0x3fa   :  { %v1014_v36 = vadd.f32 %v1013_v35, %v984_v34 }
 0x3fc   :  { %v1017_v39 = vmul.f32 0.999995, %v1014_v36 }
 0x3fe   :  { %v1023_v40 = vadd.f32 %v1251_v38, %v1017_v39 }
 0x400   :  { %v1025_v42 = vmax.f32 %v1023_v40, 0.0 }
 0x402   :  { %1214 = vmatmul.msk.f32.vlgmr.msrb.gmra.mxu3 %vm1032_vm9, %v1025_v42 }
 0x40a   :  { %1216 = vmatmul.msk.f32.vlgmr.msra.gmra.mxu3 %vm1032_vm9, %v1024_v44 }
 0x485   :  { %v1056_v45 = vpop.f32.mrf.mxu3 }
 0x48d   :  { %v1082_v46 = vpop.f32.mrf.mxu3 }
 0x48e   :  { %v1083_v48 = vadd.f32 %v1082_v46, %v1056_v45 }
 0x490   :  { %v1113_v51 = vadd.f32 %v1110_v47, %v1083_v48 }
 0x492   :  { %v1118_v52 = vadd.f32 %v1252_v49, %v1113_v51 }
 0x494   :  { %1120 = vst.msk [vmem:[%s1662_s20] sm:$0xff] %vm1119_vm10, %v1118_v52 }

</bundles_post_ra>
